<compile_context>
chip_gen: v7x
topology: tpu7x:2x2x1
jax: 0.10.0
libtpu: 0.0.40
codegen_flags: <defaults>
</compile_context>

<pallas_src>
import math

import jax
import jax.numpy as jnp
from jax import lax
from jax.experimental import pallas as pl
from jax.experimental.pallas import tpu as pltpu

EMBED_DIM_IN = 128
EMBED_DIM_OUT = 512  # = 128 * 4


# ----------------------------------------------------------------------------
# Sinusoidal timestep embedding (tiny, scalar-driven glue — stays in plain JAX)
# ----------------------------------------------------------------------------
def get_timestep_embedding(timesteps, embedding_dim):
    assert timesteps.ndim == 1
    half_dim = embedding_dim // 2
    emb = math.log(10000.0) / (half_dim - 1)
    emb = jnp.exp(jnp.arange(half_dim, dtype=jnp.float32) * -emb)
    emb = timesteps.astype(jnp.float32)[:, None] * emb[None, :]
    emb = jnp.concatenate([jnp.sin(emb), jnp.cos(emb)], axis=1)
    if embedding_dim % 2 == 1:
        emb = jnp.pad(emb, ((0, 0), (0, 1)))
    return emb


# ----------------------------------------------------------------------------
# Pallas kernel 1: timestep MLP   out = silu(e @ W0 + b0) @ W1 + b1
#   W0/W1 stored in bf16 (halves the weight DMA which dominates this tiny kernel);
#   all accumulation stays in f32.
# ----------------------------------------------------------------------------
def temb_mlp_kernel(e_ref, w0_ref, b0_ref, w1_ref, b1_ref, o_ref):
    e = e_ref[...]                                                 # (Bp, 128) f32
    h = jnp.dot(e, w0_ref[...].astype(jnp.float32),
                preferred_element_type=jnp.float32) + b0_ref[...]
    h = h * jax.nn.sigmoid(h)                                      # SiLU (sigmoid -> EUP)
    out = jnp.dot(h, w1_ref[...].astype(jnp.float32),
                  preferred_element_type=jnp.float32) + b1_ref[...]
    o_ref[...] = out.astype(o_ref.dtype)


def temb_mlp(emb, w0, b0, w1, b1):
    B = emb.shape[0]
    Bp = ((B + 7) // 8) * 8                       # pad batch to a full sublane tile
    emb_p = emb if Bp == B else jnp.pad(emb, ((0, Bp - B), (0, 0)))
    out = pl.pallas_call(
        temb_mlp_kernel,
        out_shape=jax.ShapeDtypeStruct((Bp, EMBED_DIM_OUT), jnp.float32),
        grid=(1,),
        in_specs=[
            pl.BlockSpec((Bp, EMBED_DIM_IN), lambda i: (0, 0)),
            pl.BlockSpec((EMBED_DIM_IN, EMBED_DIM_OUT), lambda i: (0, 0)),
            pl.BlockSpec((1, EMBED_DIM_OUT), lambda i: (0, 0)),
            pl.BlockSpec((EMBED_DIM_OUT, EMBED_DIM_OUT), lambda i: (0, 0)),
            pl.BlockSpec((1, EMBED_DIM_OUT), lambda i: (0, 0)),
        ],
        out_specs=pl.BlockSpec((Bp, EMBED_DIM_OUT), lambda i: (0, 0)),
    )(emb_p, w0, b0, w1, b1)
    return out[:B]


# ----------------------------------------------------------------------------
# Pallas kernel 2: 3x3x3 Conv3d (pad=1, stride=1) + LeakyReLU(0.1)
#   One (batch, D-tile) block per grid step. The tile's D halos arrive as two 1-row
#   blocks of the same (H/W-padded) input; the kernel assembles a D-padded slab in
#   VMEM, builds a channels-first im2col matrix (pixels in lanes), runs ONE
#   K=27*Cin MXU matmul and stores the (Cout, npix) result lane-dense.
# ----------------------------------------------------------------------------
def conv3d_lrelu_kernel(body_ref, lo_ref, hi_ref, w_ref, b_ref, o_ref,
                        slab_ref, col_ref):
    # body_ref: (Cin, tD,   Hp, Wp)   H/W-padded input rows of this D tile
    # lo_ref  : (Cin, 1,    Hp, Wp)   row just below the tile (clamped dup at d==0)
    # hi_ref  : (Cin, 1,    Hp, Wp)   row just above the tile (clamped dup at last)
    # w_ref   : (Cout, 27*Cin)        im2col-ordered weight (prepared once in wrapper)
    # b_ref   : (Cout, 1)
    # o_ref   : (Cout, tD*H*W)        lane-dense output block (NC(DHW) layout)
    # slab_ref: (Cin, tD+2, Hp, Wp)   VMEM scratch: D-halo'd slab
    # col_ref : (27*Cin, tD*H*W)      VMEM scratch: im2col matrix
    Cout, npix = o_ref.shape
    Cin, tD, Hp, Wp = body_ref.shape
    H, W = Hp - 2, Wp - 2
    dt = pl.program_id(1)
    n_dt = pl.num_programs(1)

    # ---- assemble the D-padded slab (H/W borders are already zero from wrapper pad) ----
    lo_scale = jnp.where(dt > 0, 1.0, 0.0)            # zero the D halo at the volume edge
    hi_scale = jnp.where(dt < n_dt - 1, 1.0, 0.0)
    slab_ref[:, 0:1] = lo_ref[...] * lo_scale
    slab_ref[:, 1:tD + 1] = body_ref[...]
    slab_ref[:, tD + 1:tD + 2] = hi_ref[...] * hi_scale

    # ---- in-kernel im2col: 27 taps, each a lane-dense (Cin, npix) row-group of K ----
    j = 0
    for kd in range(3):
        for kh in range(3):
            for kw in range(3):
                tap = slab_ref[:, kd:kd + tD, kh:kh + H, kw:kw + W]   # (Cin, tD, H, W)
                col_ref[j * Cin:(j + 1) * Cin, :] = tap.reshape(Cin, npix)
                j += 1

    # ---- single K = 27*Cin matmul on the MXU; result is already (Cout, npix) ----
    acc = jnp.dot(w_ref[...], col_ref[...], preferred_element_type=jnp.float32)
    acc = acc + b_ref[...]                                            # bias
    acc = jnp.where(acc >= 0.0, acc, 0.1 * acc)                       # LeakyReLU(0.1)
    o_ref[...] = acc.astype(o_ref.dtype)


def _choose_tile_d(D, H, W, cin, cout, budget_bytes):
    """Largest D-tile (divisor of D, lane-aligned output block) whose f32 working
    set (double-buffered input/output + slab + im2col scratch) fits the budget."""
    def est(td):
        npix = td * H * W
        slab = cin * (td + 2) * (H + 2) * (W + 2) * 4
        col = 27 * cin * npix * 4
        body = 2 * cin * td * (H + 2) * (W + 2) * 4
        halo = 2 * 2 * cin * (H + 2) * (W + 2) * 4
        out = 2 * cout * npix * 4
        wgt = 27 * cin * cout * 4 + cout * 4
        return slab + col + body + halo + out + wgt

    cands = [d for d in range(D, 0, -1)
             if D % d == 0 and (d == D or (d * H * W) % 128 == 0)]
    for td in cands:
        if est(td) <= budget_bytes:
            return td
    return cands[-1]   # best effort (always contains D)


def conv3d_leaky_relu(x_ncdhw, conv_w, conv_b, *, vmem_budget_bytes=12 * 1024 * 1024):
    B, Cin, D, H, W = x_ncdhw.shape
    Cout = conv_w.shape[0]
    tD = _choose_tile_d(D, H, W, Cin, Cout, vmem_budget_bytes)
    nDt = D // tD
    Hp, Wp = H + 2, W + 2

    # Weight/bias prepared ONCE: (Cout,Cin,3,3,3) -> (Cout, 27*Cin),
    # K ordered (kd, kh, kw, cin) to match the in-kernel im2col row order.
    w_mat = jnp.transpose(conv_w, (0, 2, 3, 4, 1)).reshape(Cout, 27 * Cin)
    b_col = conv_b.reshape(Cout, 1)

    # Single H/W halo pad (one HBM copy). D halos are read in-kernel as 1-row blocks of
    # this same array -> no overlapping-slab duplication and no layout transpose in HBM.
    # TODO(synk): fold the H/W halo pad into the kernel via manual DMA (pl.ANY) to drop
    # this last wrapper-side HBM copy as well.
    x_hw = jnp.pad(x_ncdhw, ((0, 0), (0, 0), (0, 0), (1, 1), (1, 1)))

    out_flat = pl.pallas_call(
        conv3d_lrelu_kernel,
        out_shape=jax.ShapeDtypeStruct((B, Cout, D * H * W), jnp.float32),
        grid=(B, nDt),
        in_specs=[
            pl.BlockSpec((None, Cin, tD, Hp, Wp),
                         lambda b, dt: (b, 0, dt, 0, 0)),
            pl.BlockSpec((None, Cin, 1, Hp, Wp),
                         lambda b, dt: (b, 0, jnp.maximum(dt * tD - 1, 0), 0, 0)),
            pl.BlockSpec((None, Cin, 1, Hp, Wp),
                         lambda b, dt: (b, 0, jnp.minimum(dt * tD + tD, D - 1), 0, 0)),
            pl.BlockSpec((Cout, 27 * Cin), lambda b, dt: (0, 0)),
            pl.BlockSpec((Cout, 1), lambda b, dt: (0, 0)),
        ],
        out_specs=pl.BlockSpec((None, Cout, tD * H * W), lambda b, dt: (b, 0, dt)),
        scratch_shapes=[
            pltpu.VMEM((Cin, tD + 2, Hp, Wp), jnp.float32),
            pltpu.VMEM((27 * Cin, tD * H * W), jnp.float32),
        ],
        compiler_params=pltpu.CompilerParams(
            dimension_semantics=("parallel", "parallel"),
            vmem_limit_bytes=32 * 1024 * 1024,
        ),
    )(x_hw, x_hw, x_hw, w_mat, b_col)

    return out_flat.reshape(B, Cout, D, H, W)   # already NCDHW, just unflatten


# ----------------------------------------------------------------------------
# Parameters (deterministic init matching PyTorch shapes; not a checkpoint load)
# ----------------------------------------------------------------------------
def init_params(key, n_filters_in, n_filters_out):
    ks = jax.random.split(key, 4)

    def linear(k, fan_in, fan_out):
        bound = 1.0 / math.sqrt(fan_in)
        kw, kb = jax.random.split(k)
        w = jax.random.uniform(kw, (fan_in, fan_out), jnp.float32, -bound, bound)
        b = jax.random.uniform(kb, (fan_out,), jnp.float32, -bound, bound)
        return w, b

    w0, b0 = linear(ks[0], EMBED_DIM_IN, EMBED_DIM_OUT)   # temb.dense[0]
    w1, b1 = linear(ks[1], EMBED_DIM_OUT, EMBED_DIM_OUT)  # temb.dense[1]

    fan_in = n_filters_in * 27
    bound = 1.0 / math.sqrt(fan_in)
    conv_w = jax.random.uniform(
        ks[2], (n_filters_out, n_filters_in, 3, 3, 3), jnp.float32, -bound, bound)
    conv_b = jax.random.uniform(ks[3], (n_filters_out,), jnp.float32, -bound, bound)

    # MLP weights stored in bf16: halves the (DMA-bound) temb kernel's weight traffic.
    return dict(w0=w0.astype(jnp.bfloat16), b0=b0,
                w1=w1.astype(jnp.bfloat16), b1=b1,
                conv_w=conv_w, conv_b=conv_b)


# ----------------------------------------------------------------------------
# TimeStepEmbedding.forward equivalent
# ----------------------------------------------------------------------------
def timestep_embedding_forward(params, x_ncdhw, t=None, embeddings=None, image=None):
    if t is not None:
        emb = get_timestep_embedding(t, EMBED_DIM_IN)
        temb = temb_mlp(
            emb,
            params["w0"], params["b0"].reshape(1, -1),
            params["w1"], params["b1"].reshape(1, -1),
        )
    else:
        temb = None

    if image is not None:
        x_ncdhw = jnp.concatenate([image, x_ncdhw], axis=1)

    out = conv3d_leaky_relu(x_ncdhw, params["conv_w"], params["conv_b"])

    # ConvBlockTemb(n_stages=1): its single stage has temb_flag=False -> no temb fusion here.
    return out, temb, embeddings


if __name__ == "__main__":
    key = jax.random.PRNGKey(0)
    n_filters_in, n_filters_out = 4, 16
    B, D, H, W = 2, 8, 8, 8

    kx, kp, kx2 = jax.random.split(key, 3)
    x = jax.random.normal(kx, (B, n_filters_in, D, H, W), jnp.float32)
    t = jnp.array([3, 11], dtype=jnp.int32)
    params = init_params(kp, n_filters_in, n_filters_out)

    out, temb, emb_out = timestep_embedding_forward(params, x, t=t)
    jax.block_until_ready((out, temb))

    # ---- pure-JAX reference checks ----
    emb_ref = get_timestep_embedding(t, EMBED_DIM_IN)
    w0f = params["w0"].astype(jnp.float32)
    w1f = params["w1"].astype(jnp.float32)
    h = emb_ref @ w0f + params["b0"]
    h = h * jax.nn.sigmoid(h)
    temb_ref = h @ w1f + params["b1"]

    def conv_ref_fn(xi):
        c = lax.conv_general_dilated(
            xi, params["conv_w"], window_strides=(1, 1, 1),
            padding=((1, 1), (1, 1), (1, 1)),
            dimension_numbers=("NCDHW", "OIDHW", "NCDHW"))
        c = c + params["conv_b"][None, :, None, None, None]
        return jnp.where(c >= 0, c, 0.1 * c)

    out_ref = conv_ref_fn(x)

    assert out.shape == (B, n_filters_out, D, H, W)
    assert temb.shape == (B, EMBED_DIM_OUT)
    assert emb_out is None
    assert jnp.allclose(temb, temb_ref, atol=1e-3, rtol=1e-4)
    assert jnp.allclose(out, out_ref, atol=1e-3, rtol=1e-4)

    # Also exercise the D-tiled path (nDt > 1, interior + boundary halos) by forcing a
    # tiny VMEM budget.
    x2 = jax.random.normal(kx2, (1, n_filters_in, 16, H, W), jnp.float32)
    out2 = conv3d_leaky_relu(x2, params["conv_w"], params["conv_b"],
                             vmem_budget_bytes=200_000)
    jax.block_until_ready(out2)
    assert jnp.allclose(out2, conv_ref_fn(x2), atol=1e-3, rtol=1e-4)

    print("KERNEL_OK")
</pallas_src>

<mosaic_0001>
module attributes {stable_mosaic.version = 11 : i64} {
  func.func @temb_mlp_kernel(%arg0: i32, %arg1: memref<8x128xf32, #tpu.memory_space<vmem>>, %arg2: memref<128x512xbf16, #tpu.memory_space<vmem>>, %arg3: memref<1x512xf32, #tpu.memory_space<vmem>>, %arg4: memref<512x512xbf16, #tpu.memory_space<vmem>>, %arg5: memref<1x512xf32, #tpu.memory_space<vmem>>, %arg6: memref<8x512xf32, #tpu.memory_space<vmem>>) attributes {dimension_semantics = [#tpu.dimension_semantics<arbitrary>], iteration_bounds = array<i64: 1>, scalar_prefetch = 0 : i64, scratch_operands = 0 : i64, tpu.core_type = #tpu.core_type<tc>, window_params = [{pipeline_mode = #tpu.pipeline_mode<synchronous>, transform_indices = @transform_0, window_bounds = array<i64: 8, 128>}, {pipeline_mode = #tpu.pipeline_mode<synchronous>, transform_indices = @transform_1, window_bounds = array<i64: 128, 512>}, {pipeline_mode = #tpu.pipeline_mode<synchronous>, transform_indices = @transform_2, window_bounds = array<i64: 1, 512>}, {pipeline_mode = #tpu.pipeline_mode<synchronous>, transform_indices = @transform_3, window_bounds = array<i64: 512, 512>}, {pipeline_mode = #tpu.pipeline_mode<synchronous>, transform_indices = @transform_4, window_bounds = array<i64: 1, 512>}, {pipeline_mode = #tpu.pipeline_mode<synchronous>, transform_indices = @transform_5, window_bounds = array<i64: 8, 512>}]} {
    %c0 = arith.constant 0 : index
    %c0_0 = arith.constant 0 : index
    %0 = vector.load %arg1[%c0, %c0_0] : memref<8x128xf32, #tpu.memory_space<vmem>>, vector<8x128xf32>
    %c0_1 = arith.constant 0 : index
    %c0_2 = arith.constant 0 : index
    %1 = vector.load %arg2[%c0_1, %c0_2] : memref<128x512xbf16, #tpu.memory_space<vmem>>, vector<128x512xbf16>
    %2 = arith.extf %1 : vector<128x512xbf16> to vector<128x512xf32>
    %cst = arith.constant dense<0.000000e+00> : vector<8x512xf32>
    %3 = tpu.matmul %0, %2, %cst {dimension_numbers = #tpu.dot_dimension_numbers<[1], [0], [0], [1], [0, 0, 1, 1], [], []>} : vector<8x128xf32>, vector<128x512xf32>, vector<8x512xf32> -> vector<8x512xf32>
    %c0_3 = arith.constant 0 : index
    %c0_4 = arith.constant 0 : index
    %4 = vector.load %arg3[%c0_3, %c0_4] : memref<1x512xf32, #tpu.memory_space<vmem>>, vector<1x512xf32>
    %5 = vector.broadcast %4 : vector<1x512xf32> to vector<8x512xf32>
    %6 = arith.addf %3, %5 : vector<8x512xf32>
    %7 = arith.negf %6 : vector<8x512xf32>
    %8 = math.exp %7 : vector<8x512xf32>
    %cst_5 = arith.constant 1.000000e+00 : f32
    %9 = vector.broadcast %cst_5 : f32 to vector<8x512xf32>
    %10 = arith.addf %9, %8 : vector<8x512xf32>
    %11 = arith.divf %9, %10 : vector<8x512xf32>
    %12 = arith.mulf %6, %11 : vector<8x512xf32>
    %c0_6 = arith.constant 0 : index
    %c0_7 = arith.constant 0 : index
    %13 = vector.load %arg4[%c0_6, %c0_7] : memref<512x512xbf16, #tpu.memory_space<vmem>>, vector<512x512xbf16>
    %14 = arith.extf %13 : vector<512x512xbf16> to vector<512x512xf32>
    %cst_8 = arith.constant dense<0.000000e+00> : vector<8x512xf32>
    %15 = tpu.matmul %12, %14, %cst_8 {dimension_numbers = #tpu.dot_dimension_numbers<[1], [0], [0], [1], [0, 0, 1, 1], [], []>} : vector<8x512xf32>, vector<512x512xf32>, vector<8x512xf32> -> vector<8x512xf32>
    %c0_9 = arith.constant 0 : index
    %c0_10 = arith.constant 0 : index
    %16 = vector.load %arg5[%c0_9, %c0_10] : memref<1x512xf32, #tpu.memory_space<vmem>>, vector<1x512xf32>
    %17 = vector.broadcast %16 : vector<1x512xf32> to vector<8x512xf32>
    %18 = arith.addf %15, %17 : vector<8x512xf32>
    %c0_11 = arith.constant 0 : index
    %c0_12 = arith.constant 0 : index
    %19 = vector.load %arg6[%c0_11, %c0_12] : memref<8x512xf32, #tpu.memory_space<vmem>>, vector<8x512xf32>
    tpu.vector_store %arg6[%c0_11, %c0_12], %18 {strides = array<i32>} : memref<8x512xf32, #tpu.memory_space<vmem>>, vector<8x512xf32>,
    return
  }
  func.func @transform_0(%arg0: i32) -> (i32, i32) {
    %c0_i32 = arith.constant 0 : i32
    %c0_i32_0 = arith.constant 0 : i32
    %c0_i32_1 = arith.constant 0 : i32
    return %c0_i32, %c0_i32_0 : i32, i32
  }
  func.func @transform_1(%arg0: i32) -> (i32, i32) {
    %c0_i32 = arith.constant 0 : i32
    %c0_i32_0 = arith.constant 0 : i32
    %c0_i32_1 = arith.constant 0 : i32
    return %c0_i32, %c0_i32_0 : i32, i32
  }
  func.func @transform_2(%arg0: i32) -> (i32, i32) {
    %c0_i32 = arith.constant 0 : i32
    %c0_i32_0 = arith.constant 0 : i32
    %c0_i32_1 = arith.constant 0 : i32
    return %c0_i32, %c0_i32_0 : i32, i32
  }
  func.func @transform_3(%arg0: i32) -> (i32, i32) {
    %c0_i32 = arith.constant 0 : i32
    %c0_i32_0 = arith.constant 0 : i32
    %c0_i32_1 = arith.constant 0 : i32
    return %c0_i32, %c0_i32_0 : i32, i32
  }
  func.func @transform_4(%arg0: i32) -> (i32, i32) {
    %c0_i32 = arith.constant 0 : i32
    %c0_i32_0 = arith.constant 0 : i32
    %c0_i32_1 = arith.constant 0 : i32
    return %c0_i32, %c0_i32_0 : i32, i32
  }
  func.func @transform_5(%arg0: i32) -> (i32, i32) {
    %c0_i32 = arith.constant 0 : i32
    %c0_i32_0 = arith.constant 0 : i32
    %c0_i32_1 = arith.constant 0 : i32
    return %c0_i32, %c0_i32_0 : i32, i32
  }
}

</mosaic_0001>

<bundles_post_ra>
// kernel: tpu_custom_call.1
= control target key start
LH: loop header
LB: loop body
LE: loop exit
PB: predicated region body
PF: predicated region fallthrough
CT: control target
= control target key end

     0   :  { %10 = vsyncpa [#allocation3], 0  ;;  %s2040_s0 = inlined_call_operand.hbm [shape: f32[8,128], index: 0, kind: input, shape index: {}]   ;;  %s2041_s1 = inlined_call_operand.hbm [shape: bf16[128,512], index: 1, kind: input, shape index: {}]   ;;  %s2042_s2 = inlined_call_operand.vmem [shape: f32[1,512], index: 2, kind: input, shape index: {}]   ;;  %s2043_s3 = inlined_call_operand.hbm [shape: bf16[512,512], index: 3, kind: input, shape index: {}]   ;;  %s2044_s4 = inlined_call_operand.vmem [shape: f32[1,512], index: 4, kind: input, shape index: {}]   ;;  %s2045_s5 = inlined_call_operand.hbm [shape: f32[8,512], index: 5, kind: output, shape index: {}]  }
   0x1   :  { %11 = vsyncpa [#allocation6], 0 }
   0x2   :  { %12 = vsyncpa [#allocation4], 0  ;;  %s1908_s18 = smov [#allocation5]   ;;  %s1814_s22 = scalar_lea.hbm %s2041_s1, 4096 }
   0x3   :  { %s28_s19 = sshll.u32 %s1908_s18, 4  ;;  %p1815_p0 = scmp.ne.s32.totalorder %s2041_s1, %s1814_s22  ;;  %s29_s19 = int_to_ptr.vmem [resolvable:$true] %s28_s19 }
   0x4   :  { %p1818_p1 = scmp.lt.u32.totalorder %s1814_s22, %s2041_s1 }
   0x6   :  { %p1820_p2 = pnand %p1818_p1, %p1815_p0 }
   0x8   :  { %1823 = shalt.err (!%p1820_p2)
}
   0x9   :  { %s1824_s27 = scalar_lea.vmem %s29_s19, 4096  ;;  %p1829_p4 = scmp.lt.s32.totalorder %s29_s19, %s29_s19 }
   0xa   :  { %p1825_p3 = scmp.ne.s32.totalorder %s29_s19, %s1824_s27  ;;  %p1830_p5 = scmp.lt.s32.totalorder %s1824_s27, %s1824_s27 }
   0xc   :  { %p1831_p6 = por %p1830_p5, %p1829_p4 }
   0xe   :  { %p1832_p7 = pnand %p1831_p6, %p1825_p3 }
  0x10   :  { %1835 = shalt.err (!%p1832_p7)
}
  0x11   :  { %s1909_s28 = smov 256   ;;  %s1910_s29 = smov 16  }
  0x12   :  { %34 = dma.hbm_to_vmem [thread:$0]  %s2041_s1, 4096, %s29_s19, [#allocation6], %s1909_s28, %s1909_s28, %s1910_s29  }
  0x13   :  { %s1911_s7 = smov [#allocation2]   ;;  %s1912_s9 = smov [#allocation7]  }
  0x14   :  { %s19_s8 = sshll.u32 %s1911_s7, 4  ;;  %s42_s10 = sshll.u32 %s1912_s9, 4  ;;  %s20_s8 = int_to_ptr.vmem [resolvable:$true] %s19_s8  ;;  %s43_s10 = int_to_ptr.vmem [resolvable:$true] %s42_s10 }
  0x15   :  { %s1836_s13 = scalar_lea.hbm %s2040_s0, 128 }
  0x16   :  { %p1837_p8 = scmp.ne.s32.totalorder %s2040_s0, %s1836_s13  ;;  %p1840_p9 = scmp.lt.u32.totalorder %s1836_s13, %s2040_s0 }
  0x18   :  { %p1842_p10 = pnand %p1840_p9, %p1837_p8 }
  0x1a   :  { %1845 = shalt.err (!%p1842_p10)
}
  0x1b   :  { %s1846_s1 = scalar_lea.vmem %s20_s8, 128  ;;  %p1851_p12 = scmp.lt.s32.totalorder %s20_s8, %s20_s8 }
  0x1c   :  { %p1847_p11 = scmp.ne.s32.totalorder %s20_s8, %s1846_s1  ;;  %p1852_p13 = scmp.lt.s32.totalorder %s1846_s1, %s1846_s1 }
  0x1e   :  { %p1853_p0 = por %p1852_p13, %p1851_p12 }
  0x20   :  { %p1854_p1 = pnand %p1853_p0, %p1847_p11 }
  0x22   :  { %1857 = shalt.err (!%p1854_p1)
}
  0x23   :  { %22 = dma.hbm_to_vmem [thread:$0]  %s2040_s0, 128, %s20_s8, [#allocation3]  }
  0x24   :  { %s1858_s22 = scalar_lea.hbm %s2043_s3, 16384 }
  0x25   :  { %p1859_p2 = scmp.ne.s32.totalorder %s2043_s3, %s1858_s22  ;;  %p1862_p3 = scmp.lt.u32.totalorder %s1858_s22, %s2043_s3 }
  0x27   :  { %p1864_p4 = pnand %p1862_p3, %p1859_p2 }
  0x29   :  { %1867 = shalt.err (!%p1864_p4)
}
  0x2a   :  { %s1868_s27 = scalar_lea.vmem %s43_s10, 16384  ;;  %p1873_p6 = scmp.lt.s32.totalorder %s43_s10, %s43_s10 }
  0x2b   :  { %p1869_p5 = scmp.ne.s32.totalorder %s43_s10, %s1868_s27  ;;  %p1874_p7 = scmp.lt.s32.totalorder %s1868_s27, %s1868_s27 }
  0x2d   :  { %p1875_p8 = por %p1874_p7, %p1873_p6 }
  0x2f   :  { %p1876_p9 = pnand %p1875_p8, %p1869_p5 }
  0x31   :  { %1879 = shalt.err (!%p1876_p9)
}
  0x32   :  { %48 = dma.hbm_to_vmem [thread:$0]  %s2043_s3, 16384, %s43_s10, [#allocation6], %s1909_s28, %s1909_s28, %s1910_s29  }
  0x33   :  { %1902 = dma.done.wait [#allocation3], 128  }
  0x34   :  { %1903 = vsyncadd [#allocation3], 4294967168 }
  0x35   :  { %1904 = dma.done.wait [#allocation6], 20480  }
  0x36   :  { %1905 = vsyncadd [#allocation6], 4294946816  ;;  %v1913_v0 = vmov 0.0   ;;  %v1558_v1 = vld [vmem:[#allocation5 + $0x4] ss:$16 sps:$4 sm:$0xff]   ;;  %v60_v29 = vld [vmem:[#allocation2] sm:$0xff] }
  0x37   :  { %243 = vmatprep.mubr.f32.mxu0 %v1913_v0  ;;  %314 = vmatprep.mubr.f32.mxu1 %v1913_v0  ;;  %v1560_v2 = vld [vmem:[#allocation5] ss:$16 sps:$4 sm:$0xff]   ;;  %v1561_v3 = vld [vmem:[#allocation5 + $0x24] ss:$16 sps:$4 sm:$0xff]   ;;  %v1582_v10 = vld [vmem:[#allocation5 + $0xc] ss:$16 sps:$4 sm:$0xff]  }
  0x38   :  { %1064 = vmatprep.subr.bf16.mxu0 %v1558_v1  ;;  %v1563_v4 = vld [vmem:[#allocation5 + $0x20] ss:$16 sps:$4 sm:$0xff]   ;;  %v1564_v5 = vld [vmem:[#allocation5 + $0x44] ss:$16 sps:$4 sm:$0xff]   ;;  %v1584_v11 = vld [vmem:[#allocation5 + $0x8] ss:$16 sps:$4 sm:$0xff]   ;;  %1096 = vmatprep.subr.bf16.mxu1 %v1582_v10 }
  0x39   :  { %1066 = vmatpush1.bf16.msra.mxu0 %v1560_v2  ;;  %v1566_v6 = vld [vmem:[#allocation5 + $0x40] ss:$16 sps:$4 sm:$0xff]   ;;  %v1567_v7 = vld [vmem:[#allocation5 + $0x64] ss:$16 sps:$4 sm:$0xff]   ;;  %v1585_v12 = vld [vmem:[#allocation5 + $0x2c] ss:$16 sps:$4 sm:$0xff]   ;;  %1098 = vmatpush1.bf16.msra.mxu1 %v1584_v11 }
  0x3a   :  { %1068 = vmatprep.subr.bf16.mxu0 %v1561_v3  ;;  %v1569_v8 = vld [vmem:[#allocation5 + $0x60] ss:$16 sps:$4 sm:$0xff]   ;;  %v1570_v9 = vld [vmem:[#allocation5 + $0x84] ss:$16 sps:$4 sm:$0xff]   ;;  %v1587_v14 = vld [vmem:[#allocation5 + $0x28] ss:$16 sps:$4 sm:$0xff]   ;;  %1100 = vmatprep.subr.bf16.mxu1 %v1585_v12 }
  0x3b   :  { %v1572_v13 = vld [vmem:[#allocation5 + $0x80] ss:$16 sps:$4 sm:$0xff]   ;;  %v1588_v15 = vld [vmem:[#allocation5 + $0x4c] ss:$16 sps:$4 sm:$0xff]   ;;  %v1573_v16 = vld [vmem:[#allocation5 + $0xa4] ss:$16 sps:$4 sm:$0xff]  }
  0x3c   :  { %v1575_v17 = vld [vmem:[#allocation5 + $0xa0] ss:$16 sps:$4 sm:$0xff]   ;;  %v1590_v18 = vld [vmem:[#allocation5 + $0x48] ss:$16 sps:$4 sm:$0xff]   ;;  %v1591_v19 = vld [vmem:[#allocation5 + $0x6c] ss:$16 sps:$4 sm:$0xff]  }
  0x3d   :  { %1070 = vmatpush1.bf16.msra.mxu0 %v1563_v4  ;;  %1102 = vmatpush1.bf16.msra.mxu1 %v1587_v14  ;;  %v1576_v20 = vld [vmem:[#allocation5 + $0xc4] ss:$16 sps:$4 sm:$0xff]   ;;  %v1578_v21 = vld [vmem:[#allocation5 + $0xc0] ss:$16 sps:$4 sm:$0xff]   ;;  %v1593_v22 = vld [vmem:[#allocation5 + $0x68] ss:$16 sps:$4 sm:$0xff]  }
  0x3e   :  { %1072 = vmatprep.subr.bf16.mxu0 %v1564_v5  ;;  %1104 = vmatprep.subr.bf16.mxu1 %v1588_v15  ;;  %v1594_v23 = vld [vmem:[#allocation5 + $0x8c] ss:$16 sps:$4 sm:$0xff]   ;;  %v1579_v24 = vld [vmem:[#allocation5 + $0xe4] ss:$16 sps:$4 sm:$0xff]   ;;  %v1581_v25 = vld [vmem:[#allocation5 + $0xe0] ss:$16 sps:$4 sm:$0xff]  }
  0x3f   :  { %v1596_v26 = vld [vmem:[#allocation5 + $0x88] ss:$16 sps:$4 sm:$0xff]   ;;  %v1597_v27 = vld [vmem:[#allocation5 + $0xac] ss:$16 sps:$4 sm:$0xff]   ;;  %v1606_v28 = vld [vmem:[#allocation7 + $0x4] ss:$16 sps:$4 sm:$0xff]  }
  0x40   :  { %v1599_v30 = vld [vmem:[#allocation5 + $0xa8] ss:$16 sps:$4 sm:$0xff]   ;;  %v1600_v31 = vld [vmem:[#allocation5 + $0xcc] ss:$16 sps:$4 sm:$0xff]   ;;  %v1608_v32 = vld [vmem:[#allocation7] ss:$16 sps:$4 sm:$0xff]  }
  0x41   :  { %1074 = vmatpush1.bf16.msra.mxu0 %v1566_v6  ;;  %1106 = vmatpush1.bf16.msra.mxu1 %v1590_v18  ;;  %v1612_v33 = vld [vmem:[#allocation7 + $0x24] ss:$16 sps:$4 sm:$0xff]   ;;  %v1602_v34 = vld [vmem:[#allocation5 + $0xc8] ss:$16 sps:$4 sm:$0xff]   ;;  %v1603_v35 = vld [vmem:[#allocation5 + $0xec] ss:$16 sps:$4 sm:$0xff]  }
  0x42   :  { %1076 = vmatprep.subr.bf16.mxu0 %v1567_v7  ;;  %1108 = vmatprep.subr.bf16.mxu1 %v1591_v19  ;;  %v1614_v36 = vld [vmem:[#allocation7 + $0x20] ss:$16 sps:$4 sm:$0xff]   ;;  %v1618_v37 = vld [vmem:[#allocation7 + $0x44] ss:$16 sps:$4 sm:$0xff]   ;;  %v1605_v38 = vld [vmem:[#allocation5 + $0xe8] ss:$16 sps:$4 sm:$0xff]  }
  0x43   :  { %v1609_v39 = vld [vmem:[#allocation7 + $0xc] ss:$16 sps:$4 sm:$0xff]   ;;  %v1620_v40 = vld [vmem:[#allocation7 + $0x40] ss:$16 sps:$4 sm:$0xff]   ;;  %v1624_v41 = vld [vmem:[#allocation7 + $0x64] ss:$16 sps:$4 sm:$0xff]  }
  0x44   :  { %v1611_v42 = vld [vmem:[#allocation7 + $0x8] ss:$16 sps:$4 sm:$0xff]   ;;  %v1615_v43 = vld [vmem:[#allocation7 + $0x2c] ss:$16 sps:$4 sm:$0xff]   ;;  %v1626_v44 = vld [vmem:[#allocation7 + $0x60] ss:$16 sps:$4 sm:$0xff]  }
  0x45   :  { %1078 = vmatpush1.bf16.msra.mxu0 %v1569_v8  ;;  %1110 = vmatpush1.bf16.msra.mxu1 %v1593_v22  ;;  %v1630_v45 = vld [vmem:[#allocation7 + $0x84] ss:$16 sps:$4 sm:$0xff]   ;;  %v1617_v46 = vld [vmem:[#allocation7 + $0x28] ss:$16 sps:$4 sm:$0xff]   ;;  %v1621_v47 = vld [vmem:[#allocation7 + $0x4c] ss:$16 sps:$4 sm:$0xff]  }
  0x46   :  { %1080 = vmatprep.subr.bf16.mxu0 %v1570_v9  ;;  %1112 = vmatprep.subr.bf16.mxu1 %v1594_v23  ;;  %v1632_v48 = vld [vmem:[#allocation7 + $0x80] ss:$16 sps:$4 sm:$0xff]   ;;  %v1636_v49 = vld [vmem:[#allocation7 + $0xa4] ss:$16 sps:$4 sm:$0xff]   ;;  %v1623_v50 = vld [vmem:[#allocation7 + $0x48] ss:$16 sps:$4 sm:$0xff]  }
  0x47   :  { %v1627_v51 = vld [vmem:[#allocation7 + $0x6c] ss:$16 sps:$4 sm:$0xff]   ;;  %v1638_v52 = vld [vmem:[#allocation7 + $0xa0] ss:$16 sps:$4 sm:$0xff]   ;;  %v1642_v53 = vld [vmem:[#allocation7 + $0xc4] ss:$16 sps:$4 sm:$0xff]  }
  0x48   :  { %v1629_v54 = vld [vmem:[#allocation7 + $0x68] ss:$16 sps:$4 sm:$0xff]   ;;  %v1633_v55 = vld [vmem:[#allocation7 + $0x8c] ss:$16 sps:$4 sm:$0xff]   ;;  %v1644_v56 = vld [vmem:[#allocation7 + $0xc0] ss:$16 sps:$4 sm:$0xff]  }
  0x49   :  { %1082 = vmatpush1.bf16.msra.mxu0 %v1572_v13  ;;  %1114 = vmatpush1.bf16.msra.mxu1 %v1596_v26  ;;  %v1648_v57 = vld [vmem:[#allocation7 + $0xe4] ss:$16 sps:$4 sm:$0xff]   ;;  %v1635_v58 = vld [vmem:[#allocation7 + $0x88] ss:$16 sps:$4 sm:$0xff]   ;;  %v1639_v59 = vld [vmem:[#allocation7 + $0xac] ss:$16 sps:$4 sm:$0xff]  }
  0x4a   :  { %1084 = vmatprep.subr.bf16.mxu0 %v1573_v16  ;;  %1116 = vmatprep.subr.bf16.mxu1 %v1597_v27  ;;  %v1650_v60 = vld [vmem:[#allocation7 + $0xe0] ss:$16 sps:$4 sm:$0xff]   ;;  %v1641_v61 = vld [vmem:[#allocation7 + $0xa8] ss:$16 sps:$4 sm:$0xff]   ;;  %v1645_v62 = vld [vmem:[#allocation7 + $0xcc] ss:$16 sps:$4 sm:$0xff]  }
  0x4b   :  { %v1647_v63 = vld [vmem:[#allocation7 + $0xc8] ss:$16 sps:$4 sm:$0xff]   ;;  %v1651_v0 = vld [vmem:[#allocation7 + $0xec] ss:$16 sps:$4 sm:$0xff]   ;;  %v1654_v2 = vld [vmem:[#allocation7 + $0x104] ss:$16 sps:$4 sm:$0xff]  }
  0x4c   :  { %v1653_v1 = vld [vmem:[#allocation7 + $0xe8] ss:$16 sps:$4 sm:$0xff]   ;;  %v1657_v3 = vld [vmem:[#allocation7 + $0x10c] ss:$16 sps:$4 sm:$0xff]   ;;  %v1656_v4 = vld [vmem:[#allocation7 + $0x100] ss:$16 sps:$4 sm:$0xff]  }
  0x4d   :  { %1086 = vmatpush1.bf16.msra.mxu0 %v1575_v17  ;;  %1118 = vmatpush1.bf16.msra.mxu1 %v1599_v30  ;;  %v1659_v5 = vld [vmem:[#allocation7 + $0x108] ss:$16 sps:$4 sm:$0xff]   ;;  %v1660_v6 = vld [vmem:[#allocation7 + $0x124] ss:$16 sps:$4 sm:$0xff]   ;;  %v1663_v7 = vld [vmem:[#allocation7 + $0x12c] ss:$16 sps:$4 sm:$0xff]  }
  0x4e   :  { %1088 = vmatprep.subr.bf16.mxu0 %v1576_v20  ;;  %1120 = vmatprep.subr.bf16.mxu1 %v1600_v31  ;;  %v1662_v8 = vld [vmem:[#allocation7 + $0x120] ss:$16 sps:$4 sm:$0xff]   ;;  %v1665_v9 = vld [vmem:[#allocation7 + $0x128] ss:$16 sps:$4 sm:$0xff]   ;;  %v1666_v10 = vld [vmem:[#allocation7 + $0x144] ss:$16 sps:$4 sm:$0xff]  }
  0x4f   :  { %v1669_v11 = vld [vmem:[#allocation7 + $0x14c] ss:$16 sps:$4 sm:$0xff]   ;;  %v1668_v12 = vld [vmem:[#allocation7 + $0x140] ss:$16 sps:$4 sm:$0xff]   ;;  %v1671_v13 = vld [vmem:[#allocation7 + $0x148] ss:$16 sps:$4 sm:$0xff]  }
  0x50   :  { %v1672_v14 = vld [vmem:[#allocation7 + $0x164] ss:$16 sps:$4 sm:$0xff]   ;;  %v1675_v15 = vld [vmem:[#allocation7 + $0x16c] ss:$16 sps:$4 sm:$0xff]   ;;  %v1674_v16 = vld [vmem:[#allocation7 + $0x160] ss:$16 sps:$4 sm:$0xff]  }
  0x51   :  { %1090 = vmatpush1.bf16.msra.mxu0 %v1578_v21  ;;  %1122 = vmatpush1.bf16.msra.mxu1 %v1602_v34  ;;  %v1677_v17 = vld [vmem:[#allocation7 + $0x168] ss:$16 sps:$4 sm:$0xff]   ;;  %v1678_v18 = vld [vmem:[#allocation7 + $0x184] ss:$16 sps:$4 sm:$0xff]   ;;  %v1681_v19 = vld [vmem:[#allocation7 + $0x18c] ss:$16 sps:$4 sm:$0xff]  }
  0x52   :  { %1092 = vmatprep.subr.bf16.mxu0 %v1579_v24  ;;  %1124 = vmatprep.subr.bf16.mxu1 %v1603_v35  ;;  %v1680_v20 = vld [vmem:[#allocation7 + $0x180] ss:$16 sps:$4 sm:$0xff]   ;;  %v1683_v21 = vld [vmem:[#allocation7 + $0x188] ss:$16 sps:$4 sm:$0xff]   ;;  %v1684_v22 = vld [vmem:[#allocation7 + $0x1a4] ss:$16 sps:$4 sm:$0xff]  }
  0x53   :  { %v1687_v23 = vld [vmem:[#allocation7 + $0x1ac] ss:$16 sps:$4 sm:$0xff]   ;;  %v1686_v24 = vld [vmem:[#allocation7 + $0x1a0] ss:$16 sps:$4 sm:$0xff]   ;;  %v1690_v26 = vld [vmem:[#allocation7 + $0x1c4] ss:$16 sps:$4 sm:$0xff]  }
  0x54   :  { %v1693_v27 = vld [vmem:[#allocation7 + $0x1cc] ss:$16 sps:$4 sm:$0xff]   ;;  %v1696_v30 = vld [vmem:[#allocation7 + $0x1e4] ss:$16 sps:$4 sm:$0xff]   ;;  %s1914_s6 = smov [#allocation8]  }
  0x55   :  { %1094 = vmatpush1.bf16.msra.mxu0 %v1581_v25  ;;  %1126 = vmatpush1.bf16.msra.mxu1 %v1605_v38  ;;  %v1689_v25 = vld [vmem:[#allocation7 + $0x1a8] ss:$16 sps:$4 sm:$0xff]   ;;  %v1699_v31 = vld [vmem:[#allocation7 + $0x1ec] ss:$16 sps:$4 sm:$0xff]   ;;  %v1702_v34 = vld [vmem:[#allocation7 + $0x204] ss:$16 sps:$4 sm:$0xff]  }
  0x56   :  { %1128 = vmatprep.subr.bf16.mxu0 %v1606_v28  ;;  %1256 = vmatprep.subr.bf16.mxu1 %v1609_v39  ;;  %v1692_v28 = vld [vmem:[#allocation7 + $0x1c0] ss:$16 sps:$4 sm:$0xff]   ;;  %v1705_v35 = vld [vmem:[#allocation7 + $0x20c] ss:$16 sps:$4 sm:$0xff]   ;;  %v1993_v39 = vld [vmem:[%s2042_s2] sm:$0xf] }
  0x57   :  { %s1049_s7 = sshll.u32 %s1914_s6, 4  ;;  %s1050_s7 = int_to_ptr.vmem [resolvable:$true] %s1049_s7 }
  0x58   :  { %244 = vmatmul.mubr.f32.vlgmr.msra.gmra.mrb[0].mxu0 %v60_v29  ;;  %315 = vmatmul.mubr.f32.vlgmr.msra.gmra.mrb[0].mxu1 %v60_v29  ;;  %v1695_v29 = vld [vmem:[#allocation7 + $0x1c8] ss:$16 sps:$4 sm:$0xff]   ;;  %p1885_p11 = scmp.lt.s32.totalorder %s1050_s7, %s1050_s7 }
  0x59   :  { %1130 = vmatpush1.bf16.msra.mxu0 %v1608_v32  ;;  %1258 = vmatpush1.bf16.msra.mxu1 %v1611_v42  ;;  %v1698_v32 = vld [vmem:[#allocation7 + $0x1e0] ss:$16 sps:$4 sm:$0xff]  }
  0x5a   :  { %1132 = vmatprep.subr.bf16.mxu0 %v1612_v33  ;;  %1260 = vmatprep.subr.bf16.mxu1 %v1615_v43  ;;  %v1701_v33 = vld [vmem:[#allocation7 + $0x1e8] ss:$16 sps:$4 sm:$0xff]  }
  0x5d   :  { %1134 = vmatpush1.bf16.msra.mxu0 %v1614_v36  ;;  %1262 = vmatpush1.bf16.msra.mxu1 %v1617_v46  ;;  %v159_v36 = vlaneseq }
  0x5e   :  { %1136 = vmatprep.subr.bf16.mxu0 %v1618_v37  ;;  %1264 = vmatprep.subr.bf16.mxu1 %v1621_v47 }
  0x5f   :  { %v1987_v37 = vshrl.u32 %v159_v36, 7  ;;  %v1750_v36 = vld [vmem:[#allocation7 + $0x304] ss:$16 sps:$4 sm:$0xff]  }
  0x61   :  { %1138 = vmatpush1.bf16.msra.mxu0 %v1620_v40  ;;  %1266 = vmatpush1.bf16.msra.mxu1 %v1623_v50  ;;  %v161_v38 = vsub.s32 0, %v1987_v37  ;;  %v165_v40 = vsub.s32 1, %v1987_v37 }
  0x62   :  { %1140 = vmatprep.subr.bf16.mxu0 %v1624_v41  ;;  %1268 = vmatprep.subr.bf16.mxu1 %v1627_v51 }
  0x63   :  { %v162_v41 = vrot.slane %v1993_v39, %v161_v38  ;;  %v166_v42 = vrot.slane %v1993_v39, %v165_v40 }
  0x65   :  { %1142 = vmatpush1.bf16.msra.mxu0 %v1626_v44  ;;  %1270 = vmatpush1.bf16.msra.mxu1 %v1629_v54 }
  0x66   :  { %1144 = vmatprep.subr.bf16.mxu0 %v1630_v45  ;;  %1272 = vmatprep.subr.bf16.mxu1 %v1633_v55 }
  0x69   :  { %1146 = vmatpush1.bf16.msra.mxu0 %v1632_v48  ;;  %1274 = vmatpush1.bf16.msra.mxu1 %v1635_v58 }
  0x6a   :  { %1148 = vmatprep.subr.bf16.mxu0 %v1636_v49  ;;  %1276 = vmatprep.subr.bf16.mxu1 %v1639_v59  ;;  %v173_v49 = vsub.s32 3, %v1987_v37 }
  0x6c   :  { %v174_v50 = vrot.slane %v1993_v39, %v173_v49 }
  0x6d   :  { %1150 = vmatpush1.bf16.msra.mxu0 %v1638_v52  ;;  %1278 = vmatpush1.bf16.msra.mxu1 %v1641_v61 }
  0x6e   :  { %1152 = vmatprep.subr.bf16.mxu0 %v1642_v53  ;;  %1280 = vmatprep.subr.bf16.mxu1 %v1645_v62 }
  0x71   :  { %1154 = vmatpush1.bf16.msra.mxu0 %v1644_v56  ;;  %1282 = vmatpush1.bf16.msra.mxu1 %v1647_v63 }
  0x72   :  { %1156 = vmatprep.subr.bf16.mxu0 %v1648_v57  ;;  %1284 = vmatprep.subr.bf16.mxu1 %v1651_v0  ;;  %v1704_v0 = vld [vmem:[#allocation7 + $0x200] ss:$16 sps:$4 sm:$0xff]  }
  0x75   :  { %1158 = vmatpush1.bf16.msra.mxu0 %v1650_v60  ;;  %1286 = vmatpush1.bf16.msra.mxu1 %v1653_v1  ;;  %v1707_v1 = vld [vmem:[#allocation7 + $0x208] ss:$16 sps:$4 sm:$0xff]  }
  0x76   :  { %1160 = vmatprep.subr.bf16.mxu0 %v1654_v2  ;;  %1288 = vmatprep.subr.bf16.mxu1 %v1657_v3  ;;  %v1708_v3 = vld [vmem:[#allocation7 + $0x224] ss:$16 sps:$4 sm:$0xff]  }
  0x79   :  { %1162 = vmatpush1.bf16.msra.mxu0 %v1656_v4  ;;  %1290 = vmatpush1.bf16.msra.mxu1 %v1659_v5  ;;  %v1711_v4 = vld [vmem:[#allocation7 + $0x22c] ss:$16 sps:$4 sm:$0xff]   ;;  %v1710_v5 = vld [vmem:[#allocation7 + $0x220] ss:$16 sps:$4 sm:$0xff]  }
  0x7a   :  { %1164 = vmatprep.subr.bf16.mxu0 %v1660_v6  ;;  %1292 = vmatprep.subr.bf16.mxu1 %v1663_v7  ;;  %v1713_v6 = vld [vmem:[#allocation7 + $0x228] ss:$16 sps:$4 sm:$0xff]   ;;  %v1714_v7 = vld [vmem:[#allocation7 + $0x244] ss:$16 sps:$4 sm:$0xff]  }
  0x7d   :  { %1166 = vmatpush1.bf16.msra.mxu0 %v1662_v8  ;;  %1294 = vmatpush1.bf16.msra.mxu1 %v1665_v9  ;;  %v1717_v8 = vld [vmem:[#allocation7 + $0x24c] ss:$16 sps:$4 sm:$0xff]   ;;  %v1716_v9 = vld [vmem:[#allocation7 + $0x240] ss:$16 sps:$4 sm:$0xff]  }
  0x7e   :  { %1168 = vmatprep.subr.bf16.mxu0 %v1666_v10  ;;  %1296 = vmatprep.subr.bf16.mxu1 %v1669_v11  ;;  %v1719_v10 = vld [vmem:[#allocation7 + $0x248] ss:$16 sps:$4 sm:$0xff]   ;;  %v1720_v11 = vld [vmem:[#allocation7 + $0x264] ss:$16 sps:$4 sm:$0xff]  }
  0x81   :  { %1170 = vmatpush1.bf16.msra.mxu0 %v1668_v12  ;;  %1298 = vmatpush1.bf16.msra.mxu1 %v1671_v13  ;;  %v1723_v12 = vld [vmem:[#allocation7 + $0x26c] ss:$16 sps:$4 sm:$0xff]  }
  0x82   :  { %1172 = vmatprep.subr.bf16.mxu0 %v1672_v14  ;;  %1300 = vmatprep.subr.bf16.mxu1 %v1675_v15  ;;  %v1722_v15 = vld [vmem:[#allocation7 + $0x260] ss:$16 sps:$4 sm:$0xff]  }
  0x85   :  { %1174 = vmatpush1.bf16.msra.mxu0 %v1674_v16  ;;  %1302 = vmatpush1.bf16.msra.mxu1 %v1677_v17  ;;  %v1725_v16 = vld [vmem:[#allocation7 + $0x268] ss:$16 sps:$4 sm:$0xff]   ;;  %v1726_v17 = vld [vmem:[#allocation7 + $0x284] ss:$16 sps:$4 sm:$0xff]  }
  0x86   :  { %1176 = vmatprep.subr.bf16.mxu0 %v1678_v18  ;;  %1304 = vmatprep.subr.bf16.mxu1 %v1681_v19  ;;  %v1729_v18 = vld [vmem:[#allocation7 + $0x28c] ss:$16 sps:$4 sm:$0xff]   ;;  %v1728_v19 = vld [vmem:[#allocation7 + $0x280] ss:$16 sps:$4 sm:$0xff]  }
  0x89   :  { %1178 = vmatpush1.bf16.msra.mxu0 %v1680_v20  ;;  %1306 = vmatpush1.bf16.msra.mxu1 %v1683_v21  ;;  %v1731_v20 = vld [vmem:[#allocation7 + $0x288] ss:$16 sps:$4 sm:$0xff]   ;;  %v1732_v21 = vld [vmem:[#allocation7 + $0x2a4] ss:$16 sps:$4 sm:$0xff]  }
  0x8a   :  { %1180 = vmatprep.subr.bf16.mxu0 %v1684_v22  ;;  %1308 = vmatprep.subr.bf16.mxu1 %v1687_v23  ;;  %v1735_v22 = vld [vmem:[#allocation7 + $0x2ac] ss:$16 sps:$4 sm:$0xff]   ;;  %v169_v23 = vsub.s32 2, %v1987_v37 }
  0x8d   :  { %1182 = vmatpush1.bf16.msra.mxu0 %v1686_v24  ;;  %1310 = vmatpush1.bf16.msra.mxu1 %v1689_v25  ;;  %v1734_v24 = vld [vmem:[#allocation7 + $0x2a0] ss:$16 sps:$4 sm:$0xff]   ;;  %v1737_v25 = vld [vmem:[#allocation7 + $0x2a8] ss:$16 sps:$4 sm:$0xff]  }
  0x8e   :  { %1184 = vmatprep.subr.bf16.mxu0 %v1690_v26  ;;  %1312 = vmatprep.subr.bf16.mxu1 %v1693_v27  ;;  %v1738_v26 = vld [vmem:[#allocation7 + $0x2c4] ss:$16 sps:$4 sm:$0xff]   ;;  %v1741_v27 = vld [vmem:[#allocation7 + $0x2cc] ss:$16 sps:$4 sm:$0xff]  }
  0x91   :  { %1186 = vmatpush1.bf16.msra.mxu0 %v1692_v28  ;;  %1314 = vmatpush1.bf16.msra.mxu1 %v1695_v29  ;;  %v170_v28 = vrot.slane %v1993_v39, %v169_v23  ;;  %v1740_v29 = vld [vmem:[#allocation7 + $0x2c0] ss:$16 sps:$4 sm:$0xff]  }
  0x92   :  { %1188 = vmatprep.subr.bf16.mxu0 %v1696_v30  ;;  %1316 = vmatprep.subr.bf16.mxu1 %v1699_v31  ;;  %v1743_v30 = vld [vmem:[#allocation7 + $0x2c8] ss:$16 sps:$4 sm:$0xff]   ;;  %v1744_v31 = vld [vmem:[#allocation7 + $0x2e4] ss:$16 sps:$4 sm:$0xff]  }
  0x95   :  { %1190 = vmatpush1.bf16.msra.mxu0 %v1698_v32  ;;  %1318 = vmatpush1.bf16.msra.mxu1 %v1701_v33  ;;  %v1747_v32 = vld [vmem:[#allocation7 + $0x2ec] ss:$16 sps:$4 sm:$0xff]  }
  0x96   :  { %1192 = vmatprep.subr.bf16.mxu0 %v1702_v34  ;;  %1320 = vmatprep.subr.bf16.mxu1 %v1705_v35  ;;  %v1746_v34 = vld [vmem:[#allocation7 + $0x2e0] ss:$16 sps:$4 sm:$0xff]   ;;  %v1749_v35 = vld [vmem:[#allocation7 + $0x2e8] ss:$16 sps:$4 sm:$0xff]  }
 0x12b   :  { %v245_v43 = vpop.f32.mrb[0].mxu0  ;;  %v2006_v51 = vpop.f32.mrb[0].mxu1 }
 0x12c   :  { %v246_v44 = vadd.f32 %v245_v43, %v162_v41  ;;  %v247_v45 = vpop.f32.mrb[1].mxu0  ;;  %v318_v52 = vpop.f32.mrb[1].mxu1  ;;  %v2013_v33 = vadd.f32 %v2006_v51, %v170_v28  ;;  %v1753_v41 = vld [vmem:[#allocation7 + $0x30c] ss:$16 sps:$4 sm:$0xff]   ;;  %v1755_v43 = vld [vmem:[#allocation7 + $0x308] ss:$16 sps:$4 sm:$0xff]  }
 0x12d   :  { %v248_v46 = vadd.f32 %v247_v45, %v166_v42  ;;  %v319_v53 = vadd.f32 %v318_v52, %v174_v50  ;;  %v1752_v42 = vld [vmem:[#allocation7 + $0x300] ss:$16 sps:$4 sm:$0xff]   ;;  %v1759_v45 = vld [vmem:[#allocation7 + $0x32c] ss:$16 sps:$4 sm:$0xff]   ;;  %v1767_v52 = vld [vmem:[#allocation7 + $0x348] ss:$16 sps:$4 sm:$0xff]  }
 0x12e   :  { %v1059_v47 = vmul.f32 -1.442695, %v246_v44  ;;  %v1061_v39 = vmul.f32 -1.442695, %v2013_v33  ;;  %v1765_v50 = vld [vmem:[#allocation7 + $0x34c] ss:$16 sps:$4 sm:$0xff]  }
 0x12f   :  { %v1060_v48 = vmul.f32 -1.442695, %v248_v46  ;;  %v1062_v55 = vmul.f32 -1.442695, %v319_v53  ;;  %v1764_v51 = vld [vmem:[#allocation7 + $0x340] ss:$16 sps:$4 sm:$0xff]  }
 0x130   :  { %1798 = vpow2.f32 %v1059_v47  ;;  %v1761_v47 = vld [vmem:[#allocation7 + $0x328] ss:$16 sps:$4 sm:$0xff]  }
 0x131   :  { %1800 = vpow2.f32 %v1060_v48  ;;  %v1762_v48 = vld [vmem:[#allocation7 + $0x344] ss:$16 sps:$4 sm:$0xff]  }
 0x132   :  { %1802 = vpow2.f32 %v1062_v55  ;;  %v1770_v55 = vld [vmem:[#allocation7 + $0x360] ss:$16 sps:$4 sm:$0xff]  }
 0x13a   :  { %v1799_v54 = vpop.eup %1798 }
 0x13b   :  { %v1801_v56 = vpop.eup %1800  ;;  %v333_v57 = vadd.f32 1.0, %v1799_v54  ;;  %v1771_v54 = vld [vmem:[#allocation7 + $0x36c] ss:$16 sps:$4 sm:$0xff]  }
 0x13c   :  { %v334_v58 = vadd.f32 1.0, %v1801_v56  ;;  %v1803_v59 = vpop.eup %1802  ;;  %v1773_v56 = vld [vmem:[#allocation7 + $0x368] ss:$16 sps:$4 sm:$0xff]  }
 0x13d   :  { %1804 = vrcp.f32 %v333_v57  ;;  %v336_v61 = vadd.f32 1.0, %v1803_v59  ;;  %v1777_v59 = vld [vmem:[#allocation7 + $0x38c] ss:$16 sps:$4 sm:$0xff]  }
 0x13e   :  { %1806 = vrcp.f32 %v334_v58  ;;  %v1774_v58 = vld [vmem:[#allocation7 + $0x384] ss:$16 sps:$4 sm:$0xff]  }
 0x13f   :  { %1808 = vrcp.f32 %v336_v61  ;;  %v1776_v61 = vld [vmem:[#allocation7 + $0x380] ss:$16 sps:$4 sm:$0xff]  }
 0x140   :  { %1810 = vpow2.f32 %v1061_v39 }
 0x147   :  { %v1805_v60 = vpop.eup %1804 }
 0x148   :  { %v1807_v62 = vpop.eup %1806  ;;  %v345_v2 = vmul.f32 %v1805_v60, %v246_v44  ;;  %v1756_v44 = vld [vmem:[#allocation7 + $0x324] ss:$16 sps:$4 sm:$0xff]  }
 0x149   :  { %v346_v63 = vmul.f32 %v1807_v62, %v248_v46  ;;  %v1809_v13 = vpop.eup %1808  ;;  %v1758_v46 = vld [vmem:[#allocation7 + $0x320] ss:$16 sps:$4 sm:$0xff]   ;;  %v1779_v62 = vld [vmem:[#allocation7 + $0x388] ss:$16 sps:$4 sm:$0xff]  }
 0x14a   :  { %v348_v14 = vmul.f32 %v1809_v13, %v319_v53  ;;  %v1768_v53 = vld [vmem:[#allocation7 + $0x364] ss:$16 sps:$4 sm:$0xff]   ;;  %v1811_v57 = vpop.eup %1810  ;;  %v733_v13 = vld [vmem:[%s2044_s4] sm:$0xf]  ;;  %s1880_s4 = scalar_lea.vmem %s1050_s7, 512 }
 0x14b   :  { %819 = vmatprep.mubr.f32.mxu0 %v346_v63  ;;  %961 = vmatprep.mubr.f32.mxu1 %v346_v63  ;;  %v335_v60 = vadd.f32 1.0, %v1811_v57  ;;  %v1780_v63 = vld [vmem:[#allocation7 + $0x3a4] ss:$16 sps:$4 sm:$0xff]   ;;  %p1881_p10 = scmp.ne.s32.totalorder %s1050_s7, %s1880_s4  ;;  %p1886_p12 = scmp.lt.s32.totalorder %s1880_s4, %s1880_s4 }
 0x14c   :  { %820 = vmatmul.mubr.f32.vlgmr.msra.gmra.mrb[2].mxu0 %v345_v2  ;;  %962 = vmatmul.mubr.f32.vlgmr.msra.gmra.mrb[2].mxu1 %v345_v2  ;;  %v1785_v2 = vld [vmem:[#allocation7 + $0x3a8] ss:$16 sps:$4 sm:$0xff]  }
 0x14d   :  { %1194 = vmatpush1.bf16.msra.mxu0 %v1704_v0  ;;  %1322 = vmatpush1.bf16.msra.mxu1 %v1707_v1  ;;  %v1783_v0 = vld [vmem:[#allocation7 + $0x3ac] ss:$16 sps:$4 sm:$0xff]   ;;  %1812 = vrcp.f32 %v335_v60  ;;  %v1782_v1 = vld [vmem:[#allocation7 + $0x3a0] ss:$16 sps:$4 sm:$0xff]   ;;  %p1887_p13 = por %p1886_p12, %p1885_p11 }
 0x14e   :  { %1196 = vmatprep.subr.bf16.mxu0 %v1708_v3  ;;  %1324 = vmatprep.subr.bf16.mxu1 %v1711_v4  ;;  %v1786_v3 = vld [vmem:[#allocation7 + $0x3c4] ss:$16 sps:$4 sm:$0xff]   ;;  %v1789_v4 = vld [vmem:[#allocation7 + $0x3cc] ss:$16 sps:$4 sm:$0xff]  }
 0x14f   :  { %890 = vmatprep.mubr.f32.mxu0 %v348_v14  ;;  %1032 = vmatprep.mubr.f32.mxu1 %v348_v14  ;;  %v738_v14 = vrot.slane %v733_v13, %v161_v38  ;;  %p1888_p0 = pnand %p1887_p13, %p1881_p10 }
 0x151   :  { %1198 = vmatpush1.bf16.msra.mxu0 %v1710_v5  ;;  %1326 = vmatpush1.bf16.msra.mxu1 %v1713_v6  ;;  %v1788_v5 = vld [vmem:[#allocation7 + $0x3c0] ss:$16 sps:$4 sm:$0xff]   ;;  %v1791_v6 = vld [vmem:[#allocation7 + $0x3c8] ss:$16 sps:$4 sm:$0xff]  }
 0x152   :  { %1200 = vmatprep.subr.bf16.mxu0 %v1714_v7  ;;  %1328 = vmatprep.subr.bf16.mxu1 %v1717_v8  ;;  %v1792_v7 = vld [vmem:[#allocation7 + $0x3e4] ss:$16 sps:$4 sm:$0xff]   ;;  %v1795_v8 = vld [vmem:[#allocation7 + $0x3ec] ss:$16 sps:$4 sm:$0xff]  }
 0x155   :  { %1202 = vmatpush1.bf16.msra.mxu0 %v1716_v9  ;;  %1330 = vmatpush1.bf16.msra.mxu1 %v1719_v10  ;;  %v1794_v9 = vld [vmem:[#allocation7 + $0x3e0] ss:$16 sps:$4 sm:$0xff]   ;;  %v1797_v10 = vld [vmem:[#allocation7 + $0x3e8] ss:$16 sps:$4 sm:$0xff]  }
 0x156   :  { %1204 = vmatprep.subr.bf16.mxu0 %v1720_v11  ;;  %1332 = vmatprep.subr.bf16.mxu1 %v1723_v12 }
 0x157   :  { %v1813_v11 = vpop.eup %1812 }
 0x158   :  { %v347_v12 = vmul.f32 %v1813_v11, %v2013_v33 }
 0x159   :  { %1206 = vmatpush1.bf16.msra.mxu0 %v1722_v15  ;;  %1334 = vmatpush1.bf16.msra.mxu1 %v1725_v16  ;;  %v746_v15 = vrot.slane %v733_v13, %v169_v23  ;;  %v742_v16 = vrot.slane %v733_v13, %v165_v40 }
 0x15a   :  { %1208 = vmatprep.subr.bf16.mxu0 %v1726_v17  ;;  %1336 = vmatprep.subr.bf16.mxu1 %v1729_v18  ;;  %v750_v17 = vrot.slane %v733_v13, %v173_v49 }
 0x15d   :  { %1210 = vmatpush1.bf16.msra.mxu0 %v1728_v19  ;;  %1338 = vmatpush1.bf16.msra.mxu1 %v1731_v20 }
 0x15e   :  { %1212 = vmatprep.subr.bf16.mxu0 %v1732_v21  ;;  %1340 = vmatprep.subr.bf16.mxu1 %v1735_v22 }
 0x161   :  { %1214 = vmatpush1.bf16.msra.mxu0 %v1734_v24  ;;  %1342 = vmatpush1.bf16.msra.mxu1 %v1737_v25 }
 0x162   :  { %1216 = vmatprep.subr.bf16.mxu0 %v1738_v26  ;;  %1344 = vmatprep.subr.bf16.mxu1 %v1741_v27 }
 0x165   :  { %1218 = vmatpush1.bf16.msra.mxu0 %v1740_v29  ;;  %1346 = vmatpush1.bf16.msra.mxu1 %v1743_v30 }
 0x166   :  { %1220 = vmatprep.subr.bf16.mxu0 %v1744_v31  ;;  %1348 = vmatprep.subr.bf16.mxu1 %v1747_v32 }
 0x169   :  { %1222 = vmatpush1.bf16.msra.mxu0 %v1746_v34  ;;  %1350 = vmatpush1.bf16.msra.mxu1 %v1749_v35 }
 0x16a   :  { %1224 = vmatprep.subr.bf16.mxu0 %v1750_v36  ;;  %1352 = vmatprep.subr.bf16.mxu1 %v1753_v41 }
 0x16d   :  { %1226 = vmatpush1.bf16.msra.mxu0 %v1752_v42  ;;  %1354 = vmatpush1.bf16.msra.mxu1 %v1755_v43 }
 0x16e   :  { %1228 = vmatprep.subr.bf16.mxu0 %v1756_v44  ;;  %1356 = vmatprep.subr.bf16.mxu1 %v1759_v45 }
 0x171   :  { %1230 = vmatpush1.bf16.msra.mxu0 %v1758_v46  ;;  %1358 = vmatpush1.bf16.msra.mxu1 %v1761_v47 }
 0x172   :  { %1232 = vmatprep.subr.bf16.mxu0 %v1762_v48  ;;  %1360 = vmatprep.subr.bf16.mxu1 %v1765_v50 }
 0x175   :  { %1234 = vmatpush1.bf16.msra.mxu0 %v1764_v51  ;;  %1362 = vmatpush1.bf16.msra.mxu1 %v1767_v52 }
 0x176   :  { %1236 = vmatprep.subr.bf16.mxu0 %v1768_v53  ;;  %1364 = vmatprep.subr.bf16.mxu1 %v1771_v54 }
 0x179   :  { %1238 = vmatpush1.bf16.msra.mxu0 %v1770_v55  ;;  %1366 = vmatpush1.bf16.msra.mxu1 %v1773_v56 }
 0x17a   :  { %1240 = vmatprep.subr.bf16.mxu0 %v1774_v58  ;;  %1368 = vmatprep.subr.bf16.mxu1 %v1777_v59 }
 0x17d   :  { %1242 = vmatpush1.bf16.msra.mxu0 %v1776_v61  ;;  %1370 = vmatpush1.bf16.msra.mxu1 %v1779_v62 }
 0x17e   :  { %1244 = vmatprep.subr.bf16.mxu0 %v1780_v63  ;;  %1372 = vmatprep.subr.bf16.mxu1 %v1783_v0 }
 0x181   :  { %1246 = vmatpush1.bf16.msra.mxu0 %v1782_v1  ;;  %1374 = vmatpush1.bf16.msra.mxu1 %v1785_v2 }
 0x182   :  { %1248 = vmatprep.subr.bf16.mxu0 %v1786_v3  ;;  %1376 = vmatprep.subr.bf16.mxu1 %v1789_v4 }
 0x185   :  { %1250 = vmatpush1.bf16.msra.mxu0 %v1788_v5  ;;  %1378 = vmatpush1.bf16.msra.mxu1 %v1791_v6 }
 0x186   :  { %1252 = vmatprep.subr.bf16.mxu0 %v1792_v7  ;;  %1380 = vmatprep.subr.bf16.mxu1 %v1795_v8 }
 0x189   :  { %1254 = vmatpush1.bf16.msra.mxu0 %v1794_v9  ;;  %1382 = vmatpush1.bf16.msra.mxu1 %v1797_v10 }
 0x18c   :  { %891 = vmatmul.mubr.f32.vlgmr.msra.gmra.mrb[2].mxu0 %v347_v12  ;;  %1033 = vmatmul.mubr.f32.vlgmr.msra.gmra.mrb[2].mxu1 %v347_v12 }
 0x25f   :  { %v892_v18 = vpop.f32.mrb[2].mxu0  ;;  %v1034_v19 = vpop.f32.mrb[2].mxu1 }
 0x260   :  { %v1383_v20 = vadd.f32 %v892_v18, %v738_v14  ;;  %v1385_v21 = vadd.f32 %v1034_v19, %v746_v15  ;;  %v894_v22 = vpop.f32.mrb[3].mxu0  ;;  %v1036_v24 = vpop.f32.mrb[3].mxu1 }
 0x261   :  { %v1384_v25 = vadd.f32 %v894_v22, %v742_v16  ;;  %v1386_v26 = vadd.f32 %v1036_v24, %v750_v17 }
 0x262   :  { %1039 = vst [vmem:[#allocation8] sm:$0xff] %v1383_v20  ;;  %1041 = vst [vmem:[#allocation8 + $0x10] sm:$0xff] %v1385_v21 }
 0x263   :  { %1040 = vst [vmem:[#allocation8 + $0x8] sm:$0xff] %v1384_v25  ;;  %1042 = vst [vmem:[#allocation8 + $0x18] sm:$0xff] %v1386_v26 }
 0x264   :  { %1891 = shalt.err (!%p1888_p0)
}
 0x265   :  { %s1892_s10 = scalar_lea.hbm %s2045_s5, 512 }
 0x266   :  { %p1893_p1 = scmp.ne.s32.totalorder %s2045_s5, %s1892_s10  ;;  %p1896_p2 = scmp.lt.u32.totalorder %s1892_s10, %s2045_s5 }
 0x268   :  { %p1898_p3 = pnand %p1896_p2, %p1893_p1 }
 0x26a   :  { %1901 = shalt.err (!%p1898_p3)
}
 0x26b   :  { %1052 = dma.vmem_to_hbm [thread:$0]  %s1050_s7, 512, %s2045_s5, [#allocation4]  }
 0x26c   :  { %1906 = dma.done.wait [#allocation4], 512  }
 0x26d   :  { %1907 = vsyncadd [#allocation4], 4294966784 }
 0x26e   :  { %1056 = vsyncpa [#allocation3], 1 }
 0x26f   :  { %1057 = vsyncpa [#allocation6], 1 }
 0x270   :  { %1058 = vsyncpa [#allocation4], 1 }

</bundles_post_ra>
